<compile_context>
chip_gen: v7x
topology: tpu7x:2x2x1
jax: 0.10.0
libtpu: 0.0.40
codegen_flags: <defaults>
</compile_context>

<pallas_src>
import functools

import jax
import jax.numpy as jnp
from jax.experimental import pallas as pl
from jax.experimental.pallas import tpu as pltpu


# ----------------------------------------------------------------------------
# Kernels (one grid step = one batch tile; weights resident across steps)
# ----------------------------------------------------------------------------
def _linear_kernel(x_ref, w_ref, o_ref, *, squash):
    # Transition(trans_type='linear'): out = Linear(x)  (no bias)
    x = x_ref[...]
    if squash:
        x = jnp.tanh(x)
    o_ref[...] = jnp.dot(
        x, w_ref[...], preferred_element_type=jnp.float32
    ).astype(o_ref.dtype)


def _mlp_kernel(x_ref, w1_ref, b1_ref, w2_ref, b2_ref, w3_ref, b3_ref, o_ref,
                *, squash):
    # Transition(trans_type='mlp'):
    #   Linear -> ReLU -> Linear -> ReLU -> Linear   (all with bias)
    # Hidden dim is zero-padded to a multiple of 128 (exact; pads stay zero).
    x = x_ref[...]
    if squash:
        x = jnp.tanh(x)
    h = jnp.dot(x, w1_ref[...], preferred_element_type=jnp.float32) + b1_ref[...]
    h = jnp.maximum(h, 0.0)
    h = jnp.dot(h, w2_ref[...], preferred_element_type=jnp.float32) + b2_ref[...]
    h = jnp.maximum(h, 0.0)
    out = jnp.dot(h, w3_ref[...], preferred_element_type=jnp.float32) + b3_ref[...]
    o_ref[...] = out.astype(o_ref.dtype)


# ----------------------------------------------------------------------------
# One-time parameter preparation (hoisted out of the forward call)
# ----------------------------------------------------------------------------
def _round_up(n, m):
    return ((n + m - 1) // m) * m


def prepare_linear_params(w):
    """w: PyTorch layout (Z, Din). Stores the pre-transposed (Din, Z) weight."""
    return {"wt": jnp.transpose(jnp.asarray(w))}


def prepare_mlp_params(w1, b1, w2, b2, w3, b3, *, lane_pad=128):
    """PyTorch layouts: w1 (H, Din), w2 (H, H), w3 (Z, H); biases 1-D.

    Weights are transposed to (in, out) and the hidden dim is zero-padded to a
    multiple of `lane_pad` so in-kernel intermediates are lane-dense.
    """
    w1, b1 = jnp.asarray(w1), jnp.asarray(b1)
    w2, b2 = jnp.asarray(w2), jnp.asarray(b2)
    w3, b3 = jnp.asarray(w3), jnp.asarray(b3)
    H, Din = w1.shape
    Z = w3.shape[0]
    Hp = _round_up(H, lane_pad)
    dt = w1.dtype

    w1t = jnp.zeros((Din, Hp), dt).at[:, :H].set(w1.T)
    b1p = jnp.zeros((1, Hp), dt).at[:, :H].set(b1.reshape(1, H))
    w2t = jnp.zeros((Hp, Hp), dt).at[:H, :H].set(w2.T)
    b2p = jnp.zeros((1, Hp), dt).at[:, :H].set(b2.reshape(1, H))
    w3t = jnp.zeros((Hp, Z), dt).at[:H, :].set(w3.T)
    b3p = b3.reshape(1, Z)
    return {"w1t": w1t, "b1": b1p, "w2t": w2t, "b2": b2p, "w3t": w3t, "b3": b3p}


# ----------------------------------------------------------------------------
# Forward wrappers
# ----------------------------------------------------------------------------
def _pick_batch_tile(B, max_tile=512):
    for tb in (512, 256, 128, 64, 32, 16, 8):
        if tb <= max_tile and tb <= B and B % tb == 0:
            return tb
    return B  # fall back to the whole batch (grid of 1)


def transition_linear(x, params, *, squash=False):
    """x: (B, Din) float32; params from prepare_linear_params. Returns (B, Z)."""
    wt = params["wt"]
    B, Din = x.shape
    Z = wt.shape[1]
    TB = _pick_batch_tile(B)
    grid = (B // TB,)

    cost = pl.CostEstimate(
        flops=2 * B * Din * Z,
        transcendentals=(B * Din) if squash else 0,
        bytes_accessed=4 * (B * Din + Din * Z + B * Z),
    )
    return pl.pallas_call(
        functools.partial(_linear_kernel, squash=squash),
        out_shape=jax.ShapeDtypeStruct((B, Z), x.dtype),
        grid_spec=pltpu.PrefetchScalarGridSpec(
            num_scalar_prefetch=0,
            grid=grid,
            in_specs=[
                pl.BlockSpec((TB, Din), lambda i: (i, 0)),
                pl.BlockSpec((Din, Z), lambda i: (0, 0)),   # weight stays resident
            ],
            out_specs=pl.BlockSpec((TB, Z), lambda i: (i, 0)),
        ),
        compiler_params=pltpu.CompilerParams(
            dimension_semantics=("parallel",)),
        cost_estimate=cost,
    )(x, wt)


def transition_mlp(x, params, *, squash=False):
    """x: (B, Din) float32; params from prepare_mlp_params. Returns (B, Z)."""
    B, Din = x.shape
    Hp = params["w1t"].shape[1]
    Z = params["w3t"].shape[1]
    TB = _pick_batch_tile(B)
    grid = (B // TB,)

    cost = pl.CostEstimate(
        flops=2 * B * (Din * Hp + Hp * Hp + Hp * Z),
        transcendentals=(B * Din) if squash else 0,
        bytes_accessed=4 * (B * Din + Din * Hp + Hp + Hp * Hp + Hp
                            + Hp * Z + Z + B * Z),
    )
    return pl.pallas_call(
        functools.partial(_mlp_kernel, squash=squash),
        out_shape=jax.ShapeDtypeStruct((B, Z), x.dtype),
        grid_spec=pltpu.PrefetchScalarGridSpec(
            num_scalar_prefetch=0,
            grid=grid,
            in_specs=[
                pl.BlockSpec((TB, Din), lambda i: (i, 0)),
                pl.BlockSpec((Din, Hp), lambda i: (0, 0)),  # weights/biases
                pl.BlockSpec((1, Hp), lambda i: (0, 0)),    # stay resident
                pl.BlockSpec((Hp, Hp), lambda i: (0, 0)),
                pl.BlockSpec((1, Hp), lambda i: (0, 0)),
                pl.BlockSpec((Hp, Z), lambda i: (0, 0)),
                pl.BlockSpec((1, Z), lambda i: (0, 0)),
            ],
            out_specs=pl.BlockSpec((TB, Z), lambda i: (i, 0)),
        ),
        compiler_params=pltpu.CompilerParams(
            dimension_semantics=("parallel",)),
        cost_estimate=cost,
    )(x, params["w1t"], params["b1"], params["w2t"], params["b2"],
      params["w3t"], params["b3"])


# ----------------------------------------------------------------------------
# Reference (plain JAX, PyTorch-layout weights) for sanity check
# ----------------------------------------------------------------------------
def _ref_linear(x, w, squash):
    if squash:
        x = jnp.tanh(x)
    return x @ w.T


def _ref_mlp(x, p, squash):
    if squash:
        x = jnp.tanh(x)
    h = jnp.maximum(x @ p["w1"].T + p["b1"], 0.0)
    h = jnp.maximum(h @ p["w2"].T + p["b2"], 0.0)
    return h @ p["w3"].T + p["b3"]


# ----------------------------------------------------------------------------
if __name__ == "__main__":
    key = jax.random.PRNGKey(0)

    # Shapes consistent with the module's forward (z_dim=32, action_dim=8,
    # hidden_size=32): x = concat([z, a]) of width 40.
    z_dim = 32
    action_dim = 8
    hidden = 32
    d_in = z_dim + action_dim

    k_x, k_xb, k_wl, k_w1, k_b1, k_w2, k_b2, k_w3, k_b3 = jax.random.split(key, 9)
    x_small = jax.random.normal(k_x, (8, d_in), dtype=jnp.float32)
    x_big = jax.random.normal(k_xb, (1024, d_in), dtype=jnp.float32)

    # --- trans_type='linear': nn.Linear(z+a, z, bias=False) ----------------
    w_lin = jax.random.normal(k_wl, (z_dim, d_in), dtype=jnp.float32) * 0.1
    lin_params = prepare_linear_params(w_lin)      # one-time prep (hoisted)

    out_lin = transition_linear(x_small, lin_params, squash=False)
    jax.block_until_ready(out_lin)
    assert jnp.allclose(out_lin, _ref_linear(x_small, w_lin, False),
                        atol=1e-5, rtol=1e-5)

    # --- trans_type='mlp' with squash=True ----------------------------------
    torch_params = {
        "w1": jax.random.normal(k_w1, (hidden, d_in), dtype=jnp.float32) * 0.1,
        "b1": jax.random.normal(k_b1, (hidden,), dtype=jnp.float32) * 0.1,
        "w2": jax.random.normal(k_w2, (hidden, hidden), dtype=jnp.float32) * 0.1,
        "b2": jax.random.normal(k_b2, (hidden,), dtype=jnp.float32) * 0.1,
        "w3": jax.random.normal(k_w3, (z_dim, hidden), dtype=jnp.float32) * 0.1,
        "b3": jax.random.normal(k_b3, (z_dim,), dtype=jnp.float32) * 0.1,
    }
    mlp_params = prepare_mlp_params(
        torch_params["w1"], torch_params["b1"],
        torch_params["w2"], torch_params["b2"],
        torch_params["w3"], torch_params["b3"],
    )                                               # one-time prep (hoisted)

    out_mlp = transition_mlp(x_small, mlp_params, squash=True)
    jax.block_until_ready(out_mlp)
    assert jnp.allclose(out_mlp, _ref_mlp(x_small, torch_params, True),
                        atol=1e-5, rtol=1e-5)

    # --- batched path: exercises batch tiling (grid=(2,), TB=512) ----------
    out_big = transition_mlp(x_big, mlp_params, squash=True)
    jax.block_until_ready(out_big)
    assert jnp.allclose(out_big, _ref_mlp(x_big, torch_params, True),
                        atol=1e-5, rtol=1e-5)

    out_big_lin = transition_linear(x_big, lin_params, squash=True)
    jax.block_until_ready(out_big_lin)
    assert jnp.allclose(out_big_lin, _ref_linear(x_big, w_lin, True),
                        atol=1e-5, rtol=1e-5)

    print("KERNEL_OK")
</pallas_src>

<mosaic_0001>
module attributes {stable_mosaic.version = 11 : i64} {
  func.func @_linear_kernel(%arg0: i32, %arg1: memref<8x40xf32, #tpu.memory_space<vmem>>, %arg2: memref<40x32xf32, #tpu.memory_space<vmem>>, %arg3: memref<8x32xf32, #tpu.memory_space<vmem>>) attributes {dimension_semantics = [#tpu.dimension_semantics<parallel>], iteration_bounds = array<i64: 1>, scalar_prefetch = 0 : i64, scratch_operands = 0 : i64, tpu.core_type = #tpu.core_type<tc>, window_params = [{transform_indices = @transform_0, window_bounds = array<i64: 8, 40>}, {pipeline_mode = #tpu.pipeline_mode<synchronous>, transform_indices = @transform_1, window_bounds = array<i64: 40, 32>}, {transform_indices = @transform_2, window_bounds = array<i64: 8, 32>}]} {
    %c0 = arith.constant 0 : index
    %c0_0 = arith.constant 0 : index
    %0 = vector.load %arg1[%c0, %c0_0] : memref<8x40xf32, #tpu.memory_space<vmem>>, vector<8x40xf32>
    %c0_1 = arith.constant 0 : index
    %c0_2 = arith.constant 0 : index
    %1 = vector.load %arg2[%c0_1, %c0_2] : memref<40x32xf32, #tpu.memory_space<vmem>>, vector<40x32xf32>
    %cst = arith.constant dense<0.000000e+00> : vector<8x32xf32>
    %2 = tpu.matmul %0, %1, %cst {dimension_numbers = #tpu.dot_dimension_numbers<[1], [0], [0], [1], [0, 0, 1, 1], [], []>} : vector<8x40xf32>, vector<40x32xf32>, vector<8x32xf32> -> vector<8x32xf32>
    %c0_3 = arith.constant 0 : index
    %c0_4 = arith.constant 0 : index
    %3 = vector.load %arg3[%c0_3, %c0_4] : memref<8x32xf32, #tpu.memory_space<vmem>>, vector<8x32xf32>
    tpu.vector_store %arg3[%c0_3, %c0_4], %2 {strides = array<i32>} : memref<8x32xf32, #tpu.memory_space<vmem>>, vector<8x32xf32>,
    return
  }
  func.func @transform_0(%arg0: i32) -> (i32, i32) {
    %c0_i32 = arith.constant 0 : i32
    %c0_i32_0 = arith.constant 0 : i32
    return %arg0, %c0_i32 : i32, i32
  }
  func.func @transform_1(%arg0: i32) -> (i32, i32) {
    %c0_i32 = arith.constant 0 : i32
    %c0_i32_0 = arith.constant 0 : i32
    %c0_i32_1 = arith.constant 0 : i32
    return %c0_i32, %c0_i32_0 : i32, i32
  }
  func.func @transform_2(%arg0: i32) -> (i32, i32) {
    %c0_i32 = arith.constant 0 : i32
    %c0_i32_0 = arith.constant 0 : i32
    return %arg0, %c0_i32 : i32, i32
  }
}

</mosaic_0001>

<bundles_post_ra>
// kernel: tpu_custom_call.1
= control target key start
LH: loop header
LB: loop body
LE: loop exit
PB: predicated region body
PF: predicated region fallthrough
CT: control target
= control target key end

     0   :  { %v162_v3 = vmov 0.0|0.0   ;;  %vm163_vm0 = vmmov 0   ;;  %v164_v6 = vmov 0.0   ;;  %s211_s0 = inlined_call_operand.vmem [shape: f32[8,40], index: 0, kind: input, shape index: {}]   ;;  %s212_s1 = inlined_call_operand.vmem [shape: f32[40,32], index: 1, kind: input, shape index: {}]   ;;  %s213_s2 = inlined_call_operand.hbm [shape: f32[8,32], index: 2, kind: output, shape index: {}]  }
   0x1   :  { %v13_v0 = vld [vmem:[%s212_s1] sm:$0xff]  ;;  %v14_v1 = vld [vmem:[%s212_s1 + $0x8] sm:$0xff]  ;;  %v15_v2 = vld [vmem:[%s212_s1 + $0x10] sm:$0xff]  ;;  %128 = vmatprep.subr.bf16.mxu0 %v162_v3  ;;  %125 = vmatprep.mubr.msk.f32.mxu0 %vm163_vm0, %v164_v6 }
   0x2   :  { %v129_v4 = vpack.c.bf16 %v14_v1, %v13_v0  ;;  %v16_v5 = vld [vmem:[%s212_s1 + $0x18] sm:$0xff] }
   0x3   :  { %7 = vsyncpa [#allocation3], 0  ;;  %v132_v7 = vpack.c.bf16 %v16_v5, %v15_v2  ;;  %v17_v8 = vld [vmem:[%s212_s1 + $0x20] sm:$0xff]  ;;  %vm18_vm1 = vcmask 326656   ;;  %s165_s21 = smov [#allocation2]   ;;  %vm92_vm2 = vcmask 261120  }
   0x4   :  { %130 = vmatpush3.bf16.msra.mxu0 %v129_v4  ;;  %v12_v9 = vld [vmem:[%s211_s0] sm:$0xff]  ;;  %s100_s22 = sshll.u32 %s165_s21, 4  ;;  %s101_s22 = int_to_ptr.vmem [resolvable:$true] %s100_s22 }
   0x5   :  { %131 = vmatprep.subr.bf16.mxu0 %v162_v3  ;;  %s138_s23 = scalar_lea.vmem %s101_s22, 128  ;;  %p143_p1 = scmp.lt.s32.totalorder %s101_s22, %s101_s22 }
   0x6   :  { %p139_p0 = scmp.ne.s32.totalorder %s101_s22, %s138_s23  ;;  %p144_p2 = scmp.lt.s32.totalorder %s138_s23, %s138_s23 }
   0x8   :  { %133 = vmatpush3.bf16.msra.mxu0 %v132_v7  ;;  %p145_p3 = por %p144_p2, %p143_p1 }
   0x9   :  { %123 = vmatprep.subr.mxu0 %v164_v6 }
   0xa   :  { %p146_p4 = pnand %p145_p3, %p139_p0 }
   0xc   :  { %124 = vmatpush3.msra.mxu0 %v17_v8 }
   0xd   :  { %126 = vmatmul.mubr.msk.f32.vlgmr.msra.gmra.mrb[0].mxu0 %vm18_vm1, %v12_v9 }
  0xe0   :  { %v88_v10 = vpop.f32.mrb[0].mxu0 }
  0xe1   :  { %93 = vst.msk [vmem:[#allocation2] sm:$0xff] %vm92_vm2, %v88_v10  ;;  %v127_v11 = vpop.f32.mrb[1].mxu0 }
  0xe2   :  { %149 = shalt.err (!%p146_p4)
}
  0xe3   :  { %s150_s0 = scalar_lea.hbm %s213_s2, 128 }
  0xe4   :  { %p151_p5 = scmp.ne.s32.totalorder %s213_s2, %s150_s0  ;;  %p154_p6 = scmp.lt.u32.totalorder %s150_s0, %s213_s2 }
  0xe6   :  { %p156_p7 = pnand %p154_p6, %p151_p5 }
  0xe8   :  { %159 = shalt.err (!%p156_p7)
}
  0xe9   :  { %103 = dma.vmem_to_hbm [thread:$0]  %s101_s22, 128, %s213_s2, [#allocation3]  }
  0xea   :  { %160 = dma.done.wait [#allocation3], 128  }
  0xeb   :  { %161 = vsyncadd [#allocation3], 4294967168 }
  0xec   :  { %107 = vsyncpa [#allocation3], 1 }

</bundles_post_ra>
